<compile_context>
chip_gen: v7x
topology: tpu7x:2x2x1
jax: 0.10.0
libtpu: 0.0.40
codegen_flags: <defaults>
</compile_context>

<pallas_src>
import functools

import jax
import jax.numpy as jnp
from jax import lax
from jax.experimental import pallas as pl
from jax.experimental.pallas import tpu as pltpu


# --------------------------------------------------------------------------------------
# Kernels
# --------------------------------------------------------------------------------------

def _q_proj_kernel(x_ref, w_ref, o_ref):
    """o = x @ W for one (batch, row-tile). W already has 1/sqrt(d) folded in (Q projection)."""
    o_ref[0] = jnp.dot(x_ref[0], w_ref[...],
                       preferred_element_type=jnp.float32).astype(o_ref.dtype)


def _kv_proj_kernel(x_ref, wk_ref, wv_ref, k_ref, v_ref):
    """K and V projections for one (batch, row-tile); shares the memory-antecedent DMA."""
    x = x_ref[0]
    k_ref[0] = jnp.dot(x, wk_ref[...], preferred_element_type=jnp.float32).astype(k_ref.dtype)
    v_ref[0] = jnp.dot(x, wv_ref[...], preferred_element_type=jnp.float32).astype(v_ref.dtype)


def _attn_kernel(q_ref, k_ref, v_ref, wo_ref, out_ref, attn_ref, *, n_heads):
    """Per-head scaled-dot-product attention + fused output projection.

    q_ref   : (1, TQ, C)  pre-projected, pre-scaled queries (activation dtype)
    k_ref   : (1, Nk, C)  pre-projected keys for this batch element
    v_ref   : (1, Nk, C)  pre-projected values for this batch element
    wo_ref  : (C, C)      output projection, layout [C_in, C_out]
    out_ref : (1, TQ, C)
    attn_ref: (TQ, C)     f32 VMEM scratch holding the combined head outputs (lane-dense)
    """
    q = q_ref[0]                       # (TQ, C) activation dtype, 1/sqrt(d) already folded in
    k = k_ref[0]                       # (Nk, C)
    v = v_ref[0]                       # (Nk, C)

    C = q.shape[-1]
    d = C // n_heads

    # Contract the depth dims of q_h and k_h directly (== q_h @ k_h.T without the transpose).
    score_dims = (((1,), (1,)), ((), ()))

    for h in range(n_heads):           # static unroll (small H); slices are static lane ranges
        sl = slice(h * d, (h + 1) * d)
        s = lax.dot_general(q[:, sl], k[:, sl], score_dims,
                            preferred_element_type=jnp.float32)        # (TQ, Nk) f32

        # Numerically-stable softmax over keys, exact normalization.
        s = s - jnp.max(s, axis=-1, keepdims=True)
        e = jnp.exp(s)
        p = e / jnp.sum(e, axis=-1, keepdims=True)

        # Write this head's output into its lane slice of the scratch — no concatenate.
        attn_ref[:, sl] = jnp.dot(p.astype(v.dtype), v[:, sl],
                                  preferred_element_type=jnp.float32)  # (TQ, d) f32

    # Output projection on a lane-dense (TQ, C) operand, in the activation dtype.
    out = jnp.dot(attn_ref[...].astype(q.dtype), wo_ref[...],
                  preferred_element_type=jnp.float32)
    out_ref[0] = out.astype(out_ref.dtype)


# --------------------------------------------------------------------------------------
# Spec / hardware helpers
# --------------------------------------------------------------------------------------

def _invariant_spec(shape, index_map):
    """BlockSpec for a grid-invariant operand (projection weights): single pipeline buffer."""
    try:
        return pl.BlockSpec(shape, index_map, pipeline_mode=pl.Buffered(1))
    except Exception:  # older JAX without pipeline_mode / Buffered — fall back gracefully
        return pl.BlockSpec(shape, index_map)


def _vmem_limit_bytes():
    """Generation-aware scoped-VMEM limit with headroom (None -> compiler default)."""
    try:
        cap = int(pltpu.get_tpu_info().vmem_capacity_bytes)
    except Exception:
        return None
    # ~48 MiB on 64-MiB v7x, capped at ~96 MiB on 128-MiB v5e/v6e.
    return min(cap - cap // 4, 96 * 1024 * 1024)


def _default_block_q():
    try:
        cap = int(pltpu.get_tpu_info().vmem_capacity_bytes)
        return 256 if cap <= 64 * 1024 * 1024 else 512
    except Exception:
        return 512


# --------------------------------------------------------------------------------------
# Wrapper
# --------------------------------------------------------------------------------------

def multi_head_attention(query_antecedent, memory_antecedent,
                         wq, wk, wv, wo, *, n_heads, block_q=None, block_kv=512):
    """query_antecedent: [B, Nq, C], memory_antecedent: [B, Nk, C],
    w*: [C_in, C_out] effective (weight-norm resolved) projection matrices."""
    B, Nq, C = query_antecedent.shape
    Bm, Nk, Cm = memory_antecedent.shape
    assert B == Bm, "query/memory batch must match"
    assert C == Cm, "query/memory channels must match"
    assert C % n_heads == 0, "channels must be divisible by n_heads"

    act_dtype = query_antecedent.dtype
    d = C // n_heads
    scale = 1.0 / (float(d) ** 0.5)

    # Cast weights to the activation dtype (bf16 activations -> bf16 MXU matmuls, half the
    # weight VMEM) and fold the softmax 1/sqrt(d) scale into Wq once.
    wq = (wq * scale).astype(act_dtype)
    wk = wk.astype(act_dtype)
    wv = wv.astype(act_dtype)
    wo = wo.astype(act_dtype)

    if block_q is None:
        block_q = _default_block_q()
    block_q = min(block_q, Nq)
    block_kv = min(block_kv, Nk)

    vmem_limit = _vmem_limit_bytes()
    cp_kwargs = {} if vmem_limit is None else {"vmem_limit_bytes": vmem_limit}
    cparams = pltpu.CompilerParams(dimension_semantics=("parallel", "parallel"), **cp_kwargs)

    w_spec = _invariant_spec((C, C), lambda b, i: (0, 0))

    # ---- Q projection: computed once per query row (scale folded into Wq) -----------------
    q = pl.pallas_call(
        _q_proj_kernel,
        out_shape=jax.ShapeDtypeStruct((B, Nq, C), act_dtype),
        grid_spec=pltpu.PrefetchScalarGridSpec(
            num_scalar_prefetch=0,
            grid=(B, pl.cdiv(Nq, block_q)),
            in_specs=[pl.BlockSpec((1, block_q, C), lambda b, i: (b, i, 0)), w_spec],
            out_specs=pl.BlockSpec((1, block_q, C), lambda b, i: (b, i, 0)),
        ),
        compiler_params=cparams,
    )(query_antecedent, wq)

    # ---- K/V projections: computed once per memory row (not once per query tile) ----------
    k, v = pl.pallas_call(
        _kv_proj_kernel,
        out_shape=(jax.ShapeDtypeStruct((B, Nk, C), act_dtype),
                   jax.ShapeDtypeStruct((B, Nk, C), act_dtype)),
        grid_spec=pltpu.PrefetchScalarGridSpec(
            num_scalar_prefetch=0,
            grid=(B, pl.cdiv(Nk, block_kv)),
            in_specs=[pl.BlockSpec((1, block_kv, C), lambda b, i: (b, i, 0)),
                      w_spec, w_spec],
            out_specs=(pl.BlockSpec((1, block_kv, C), lambda b, i: (b, i, 0)),
                       pl.BlockSpec((1, block_kv, C), lambda b, i: (b, i, 0))),
        ),
        compiler_params=cparams,
    )(memory_antecedent, wk, wv)

    # ---- Attention + fused output projection -----------------------------------------------
    kernel = functools.partial(_attn_kernel, n_heads=n_heads)
    out = pl.pallas_call(
        kernel,
        out_shape=jax.ShapeDtypeStruct((B, Nq, C), act_dtype),
        grid_spec=pltpu.PrefetchScalarGridSpec(
            num_scalar_prefetch=0,
            grid=(B, pl.cdiv(Nq, block_q)),
            in_specs=[
                pl.BlockSpec((1, block_q, C), lambda b, i: (b, i, 0)),  # q tile
                pl.BlockSpec((1, Nk, C), lambda b, i: (b, 0, 0)),       # k (per batch)
                pl.BlockSpec((1, Nk, C), lambda b, i: (b, 0, 0)),       # v (per batch)
                w_spec,                                                  # Wo (invariant)
            ],
            out_specs=pl.BlockSpec((1, block_q, C), lambda b, i: (b, i, 0)),
            scratch_shapes=[pltpu.VMEM((block_q, C), jnp.float32)],
        ),
        compiler_params=cparams,
    )(q, k, v, wo)

    return out


# --------------------------------------------------------------------------------------
# Parameter setup + pure-JAX reference
# --------------------------------------------------------------------------------------

def _make_weightnorm_linear(key, channels):
    """Deterministic synthetic weight_norm(nn.Linear(C, C, bias=False)) parameters.

    Returns the effective weight in [C_in, C_out] layout so that y = x @ W_eff matches
    PyTorch's y = x @ (g * V / ||V||_row).T
    """
    kv, kg = jax.random.split(key)
    limit = jnp.sqrt(6.0 / (channels + channels))          # xavier-uniform-style init for V
    V = jax.random.uniform(kv, (channels, channels), jnp.float32, -limit, limit)
    g = jax.random.uniform(kg, (channels, 1), jnp.float32, 0.5, 1.5)
    row_norm = jnp.sqrt(jnp.sum(V * V, axis=1, keepdims=True))
    W = g * V / row_norm                                    # [out, in]
    return W.T                                              # [in, out] so that y = x @ W


def _reference(query_antecedent, memory_antecedent, wq, wk, wv, wo, n_heads):
    """Pure-JAX reference mirroring the PyTorch forward exactly."""
    B, Nq, C = query_antecedent.shape
    d = C // n_heads
    q = query_antecedent @ wq
    k = memory_antecedent @ wk
    v = memory_antecedent @ wv

    def split(t):
        b, n, c = t.shape
        return t.reshape(b, n, n_heads, d).transpose(0, 2, 1, 3)   # (B, H, N, d)

    qs, ks, vs = split(q), split(k), split(v)
    sim = (1.0 / jnp.sqrt(jnp.float32(d))) * jnp.einsum('bhqd,bhkd->bhqk', qs, ks)
    w = jax.nn.softmax(sim, axis=-1)
    out = jnp.einsum('bhqk,bhkd->bhqd', w, vs)
    out = out.transpose(0, 2, 1, 3).reshape(B, Nq, C)
    return out @ wo


if __name__ == "__main__":
    # Small shapes consistent with the module's forward
    B, Nq, Nk, C, H = 2, 16, 16, 32, 4

    key = jax.random.PRNGKey(0)
    k_qa, k_ma, k_wq, k_wk, k_wv, k_wo = jax.random.split(key, 6)

    query_antecedent = jax.random.normal(k_qa, (B, Nq, C), jnp.float32)
    memory_antecedent = jax.random.normal(k_ma, (B, Nk, C), jnp.float32)

    wq = _make_weightnorm_linear(k_wq, C)
    wk = _make_weightnorm_linear(k_wk, C)
    wv = _make_weightnorm_linear(k_wv, C)
    wo = _make_weightnorm_linear(k_wo, C)

    out = multi_head_attention(query_antecedent, memory_antecedent,
                               wq, wk, wv, wo, n_heads=H)
    out = jax.block_until_ready(out)

    ref = _reference(query_antecedent, memory_antecedent, wq, wk, wv, wo, H)
    assert out.shape == (B, Nq, C)
    # Exact softmax normalization (no approx reciprocal) lets the tolerance tighten vs. before.
    assert jnp.allclose(out, ref, atol=2e-3, rtol=2e-3), "mismatch vs reference"

    print("KERNEL_OK")
</pallas_src>

<mosaic_0001>
module attributes {stable_mosaic.version = 11 : i64} {
  func.func @_q_proj_kernel(%arg0: i32, %arg1: i32, %arg2: memref<1x16x32xf32, #tpu.memory_space<vmem>>, %arg3: memref<32x32xf32, #tpu.memory_space<vmem>>, %arg4: memref<1x16x32xf32, #tpu.memory_space<vmem>>) attributes {dimension_semantics = [#tpu.dimension_semantics<parallel>, #tpu.dimension_semantics<parallel>], iteration_bounds = array<i64: 2, 1>, scalar_prefetch = 0 : i64, scratch_operands = 0 : i64, tpu.core_type = #tpu.core_type<tc>, window_params = [{transform_indices = @transform_0, window_bounds = array<i64: 1, 16, 32>}, {pipeline_mode = #tpu.pipeline_mode<synchronous>, transform_indices = @transform_1, window_bounds = array<i64: 32, 32>}, {transform_indices = @transform_2, window_bounds = array<i64: 1, 16, 32>}]} {
    %c0 = arith.constant 0 : index
    %c0_0 = arith.constant 0 : index
    %c0_1 = arith.constant 0 : index
    %0 = vector.load %arg2[%c0, %c0_0, %c0_1] : memref<1x16x32xf32, #tpu.memory_space<vmem>>, vector<1x16x32xf32>
    %1 = vector.shape_cast %0 : vector<1x16x32xf32> to vector<16x32xf32>
    %c0_2 = arith.constant 0 : index
    %c0_3 = arith.constant 0 : index
    %2 = vector.load %arg3[%c0_2, %c0_3] : memref<32x32xf32, #tpu.memory_space<vmem>>, vector<32x32xf32>
    %cst = arith.constant dense<0.000000e+00> : vector<16x32xf32>
    %3 = tpu.matmul %1, %2, %cst {dimension_numbers = #tpu.dot_dimension_numbers<[1], [0], [0], [1], [0, 0, 1, 1], [], []>} : vector<16x32xf32>, vector<32x32xf32>, vector<16x32xf32> -> vector<16x32xf32>
    %c0_4 = arith.constant 0 : index
    %c0_5 = arith.constant 0 : index
    %c0_6 = arith.constant 0 : index
    %4 = vector.load %arg4[%c0_4, %c0_5, %c0_6] : memref<1x16x32xf32, #tpu.memory_space<vmem>>, vector<1x16x32xf32>
    %5 = vector.shape_cast %4 : vector<1x16x32xf32> to vector<16x32xf32>
    %6 = vector.shape_cast %3 : vector<16x32xf32> to vector<1x16x32xf32>
    tpu.vector_store %arg4[%c0_4, %c0_5, %c0_6], %6 {strides = array<i32>} : memref<1x16x32xf32, #tpu.memory_space<vmem>>, vector<1x16x32xf32>,
    return
  }
  func.func @transform_0(%arg0: i32, %arg1: i32) -> (i32, i32, i32) {
    %c0_i32 = arith.constant 0 : i32
    %c0_i32_0 = arith.constant 0 : i32
    return %arg0, %arg1, %c0_i32 : i32, i32, i32
  }
  func.func @transform_1(%arg0: i32, %arg1: i32) -> (i32, i32) {
    %c0_i32 = arith.constant 0 : i32
    %c0_i32_0 = arith.constant 0 : i32
    %c0_i32_1 = arith.constant 0 : i32
    return %c0_i32, %c0_i32_0 : i32, i32
  }
  func.func @transform_2(%arg0: i32, %arg1: i32) -> (i32, i32, i32) {
    %c0_i32 = arith.constant 0 : i32
    %c0_i32_0 = arith.constant 0 : i32
    return %arg0, %arg1, %c0_i32 : i32, i32, i32
  }
}

</mosaic_0001>

<bundles_post_ra>
// kernel: tpu_custom_call.1
= control target key start
LH: loop header
LB: loop body
LE: loop exit
PB: predicated region body
PF: predicated region fallthrough
CT: control target
= control target key end

     0   :  { %7 = vsyncpa [#allocation3], 0  ;;  %s920_s0 = inlined_call_operand.hbm [shape: f32[2,16,32], index: 0, kind: input, shape index: {}]   ;;  %s921_s1 = inlined_call_operand.hbm [shape: f32[32,32], index: 1, kind: input, shape index: {}]   ;;  %s922_s2 = inlined_call_operand.hbm [shape: f32[2,16,32], index: 2, kind: output, shape index: {}]  }
   0x1   :  { %9 = vsyncpa [#allocation3 + $0x1], 0 }
   0x2   :  { %10 = vsyncpa [#allocation6], 0 }
   0x3   :  { %11 = vsyncpa [#allocation4], 0 }
   0x4   :  { %13 = vsyncpa [#allocation4 + $0x1], 0  ;;  %s691_s9 = smov 0   ;;  %s693_s10 = smov 0  }
   0x5   :  { %s695_s11 = smov 0   ;;  %s697_s12 = smov 0  }
   0x6   :  { %s699_s13 = smov 0   ;;  %s701_s14 = smov 0  }
   0x7 LB: > { %s400_s15 = sadd.s32 4294967295, %s667_s14   ;;  %s401_s16 = sadd.s32 4294967294, %s667_s14   ;;  %s667_s14 = sphi %s701_s14, %s19_s14   ;;  %s663_s13 = sphi %s699_s13, %s946_s13   ;;  %s659_s12 = sphi %s697_s12, %s945_s12   ;;  %s655_s11 = sphi %s695_s11, %s944_s11   ;;  %s651_s10 = sphi %s693_s10, %s943_s10   ;;  %s647_s9 = sphi %s691_s9, %s942_s9  }
   0x8   : > { %p53_p0 = scmp.ne.s32.totalorder %s651_s10, %s647_s9  ;;  %p725_p1 = scmp.eq.s32.totalorder %s400_s15, 0 }
   0x9   : > { %p729_p2 = scmp.eq.s32.totalorder %s400_s15, 1  ;;  %p106_p3 = scmp.eq.s32.totalorder %s401_s16, 1 }
   0xa   : > { %s927_s17 = scalar_select %p725_p1, 1, 0 }
   0xb   : > { %s928_s18 = scalar_select %p729_p2, 1, 0 }
   0xc   : > { %p735_p4 = por %p725_p1, %p53_p0  ;;  %p402_p5 = scmp.ge.s32.totalorder %s667_s14, 1 }
   0xd   : > { %p740_p6 = por %p106_p3, %p53_p0  ;;  %p113_p7 = scmp.lt.s32.totalorder %s667_s14, 3 }
   0xe   : > { %s929_s19 = scalar_select %p735_p4, 1, 0 }
   0xf   : > { %s930_s20 = scalar_select %p740_p6, 1, 0 }
  0x10   : > { %p745_p8 = pnand %p402_p5, %p113_p7  ;;  %s669_s22 = smov [#allocation5]  }
  0x11   : > { %s125_s23 = sshll.u32 %s669_s22, 4  ;;  %s31_s25 = sadd.s32 1, %s663_s13  ;;  %s126_s23 = int_to_ptr.vmem [resolvable:$true] %s125_s23 }
  0x12   : > { %s931_s21 = scalar_select %p745_p8, 1, 0 }
  0x13   : > { %p454_p9 = pneg %p745_p8  ;;  %s523_s28 = scalar_lea.hbm %s921_s1, 512 }
  0x14   : > { %p524_p12 = scmp.ne.s32.totalorder %s921_s1, %s523_s28  ;;  %p530_p5 = scmp.lt.u32.totalorder %s523_s28, %s921_s1 }
  0x15   : > { %p754_p11 = pnand %p454_p9, %p725_p1 }
  0x17   : > { %p525_p13 = pneg %p754_p11 }
  0x19   : > { %p526_p0 = pnand %p525_p13, %p524_p12 }
  0x1b   : > { %p527_p3 = pneg %p526_p0 }
  0x1d   : > { %p532_p7 = pnand %p530_p5, %p527_p3 }
  0x1f   : > { %535 = shalt.err (!%p532_p7)
}
  0x20   : > { %s536_s5 = scalar_lea.vmem %s126_s23, 512  ;;  %p544_p1 = scmp.lt.s32.totalorder %s126_s23, %s126_s23 }
  0x21   : > { %p537_p9 = scmp.ne.s32.totalorder %s126_s23, %s536_s5  ;;  %p545_p4 = scmp.lt.s32.totalorder %s536_s5, %s536_s5 }
  0x23   : > { %p539_p10 = pnand %p537_p9, %p525_p13  ;;  %p546_p8 = por %p545_p4, %p544_p1 }
  0x25   : > { %p540_p6 = pneg %p539_p10 }
  0x27   : > { %p547_p2 = pnand %p546_p8, %p540_p6 }
  0x29   : > { %550 = shalt.err (!%p547_p2)
}
  0x2a   : > { %s670_s6 = smov 128   ;;  %s671_s7 = smov 8  }
  0x2b   : > { %457 = dma.hbm_to_vmem [thread:$0]  (!%p754_p11), %s921_s1, 512, %s126_s23, [#allocation6], %s670_s6, %s670_s6, %s671_s7  }
  0x2c   : > { %p33_p1 = scmp.ge.s32.totalorder %s31_s25, 2  ;;  %s40_s16 = sadd.s32 1, %s655_s11 }
  0x2d   : > { %p47_p2 = scmp.ne.s32.totalorder %s655_s11, %s651_s10  ;;  %p48_p4 = scmp.eq.s32.totalorder %s667_s14, 0 }
  0x2e   : > { %s948_s25 = smov (%p33_p1, %s31_s25), 0  ;;  %p934_p8 = scmp.ne.s32.totalorder %s928_s18, 0 }
  0x2f   : > { %p784_p6 = por %p48_p4, %p47_p2  ;;  %s35_s26 = ssub.s32 %s663_s13, %s948_s25 }
  0x30   : > { %p790_p10 = por %p934_p8, %p47_p2  ;;  %p467_p12 = scmp.lt.s32.totalorder %s667_s14, 2 }
  0x31   : > { %p38_p11 = scmp.eq.s32.totalorder %s35_s26, 0  ;;  %s139_s23 = sand.u32 1, %s655_s11  }
  0x32   : > { %s405_s27 = sshll.u32 %s139_s23, 4  ;;  %s419_s29 = sshll.u32 %s663_s13, 8 }
  0x33   : > { %s799_s28 = scalar_select %p38_p11, %s655_s11, %s40_s16  }
  0x34   : > { %s805_s4 = scalar_lea.hbm %s920_s0, %s419_s29  ;;  %s143_s18 = scalar_lea.vmem [#allocation2], %s405_s27 }
  0x35   : > { %s152_s5 = sshll.u32 %s143_s18, 4  ;;  %p811_p13 = pnand %p467_p12, %p784_p6  ;;  %s807_s5 = int_to_ptr.vmem [resolvable:$true] %s152_s5 }
  0x36   : > { %s815_s15 = scalar_lea.sflag [#allocation3], %s139_s23  ;;  %s551_s16 = scalar_lea.hbm %s805_s4, 256 }
  0x37   : > { %p552_p0 = scmp.ne.s32.totalorder %s805_s4, %s551_s16  ;;  %p553_p3 = pneg %p811_p13 }
  0x38   : > { %s556_s22 = scalar_lea.hbm %s920_s0, 512  ;;  %p557_p9 = scmp.lt.u32.totalorder %s805_s4, %s920_s0 }
  0x39   : > { %p554_p5 = pnand %p553_p3, %p552_p0  ;;  %p558_p1 = scmp.lt.u32.totalorder %s556_s22, %s551_s16 }
  0x3a   : > { %p560_p4 = scmp.lt.u32.totalorder %s551_s16, %s805_s4 }
  0x3b   : > { %p555_p7 = pneg %p554_p5  ;;  %p559_p2 = por %p558_p1, %p557_p9 }
  0x3d   : > { %p561_p6 = por %p560_p4, %p559_p2 }
  0x3f   : > { %p562_p8 = pnand %p561_p6, %p555_p7 }
  0x41   : > { %565 = shalt.err (!%p562_p8)
}
  0x42   : > { %s566_s23 = scalar_lea.vmem %s807_s5, 256  ;;  %s672_s3 = smov [#allocation2]  }
  0x43   : > { %p567_p12 = scmp.ne.s32.totalorder %s807_s5, %s566_s23  ;;  %s571_s18 = sshll.u32 %s672_s3, 4  ;;  %s572_s18 = int_to_ptr.vmem [resolvable:$false] %s571_s18 }
  0x44   : > { %s573_s26 = scalar_lea.vmem %s572_s18, 512  ;;  %p574_p5 = scmp.lt.s32.totalorder %s807_s5, %s572_s18 }
  0x45   : > { %p569_p11 = pnand %p567_p12, %p553_p3  ;;  %p575_p9 = scmp.lt.s32.totalorder %s573_s26, %s566_s23 }
  0x47   : > { %p570_p0 = pneg %p569_p11  ;;  %p576_p1 = por %p575_p9, %p574_p5 }
  0x49   : > { %p577_p2 = pnand %p576_p1, %p570_p0 }
  0x4b   : > { %580 = shalt.err (!%p577_p2)
}
  0x4c   : > { %461 = dma.hbm_to_vmem [thread:$0]  (!%p811_p13), %s805_s4, 256, %s807_s5, %s815_s15, %s670_s6, %s670_s6, %s671_s7  }
  0x4d   : > { %p937_p3 = scmp.ne.s32.totalorder %s931_s21, 0 }
  0x4e   : > { %s849_s16 = sand.u32 (!%p937_p3), 1, %s651_s10   ;;  %p938_p7 = scmp.ne.s32.totalorder (!%p937_p3), %s929_s19, 0 }
  0x4f   : > { %164 = sbr.rel (%p937_p3) target bundleno = 329 (0x149), region = 28  ;;  %s409_s27 = sshll.u32 (!%p937_p3), %s849_s16, 4 }
  0x50   : > { %s167_s22 = scalar_lea.sflag (!%p937_p3), [#allocation3], %s849_s16  ;;  %s170_s29 = scalar_lea.vmem (!%p937_p3), [#allocation2], %s409_s27 }
  0x56   : > { %634 = dma.done.wait (%p938_p7), %s167_s22, 256  }
  0x57   : > { %636 = vsyncadd (%p938_p7), %s167_s22, 4294967040  ;;  %p939_p4 = scmp.ne.s32.totalorder %s927_s17, 0 }
  0x59   : > { %638 = dma.done.wait (%p939_p4), [#allocation6], 512  }
  0x5a   : > { %640 = vsyncadd (%p939_p4), [#allocation6], 4294966784  ;;  %vm203_vm0 = vcmask 261120   ;;  %v199_v0 = vld [vmem:[#allocation5] sm:$0xff]  ;;  %v200_v1 = vld [vmem:[#allocation5 + $0x8] sm:$0xff]  ;;  %s194_s17 = scalar_lea.vmem [#allocation7], %s409_s27 }
  0x5b   : > { %v201_v2 = vld [vmem:[#allocation5 + $0x10] sm:$0xff]  ;;  %v438_v3 = vpack.c.bf16 %v200_v1, %v199_v0  ;;  %v202_v4 = vld [vmem:[#allocation5 + $0x18] sm:$0xff]  ;;  %s303_s19 = sshll.u32 %s194_s17, 4  ;;  %s420_s21 = sshll.u32 %s659_s12, 8  ;;  %s864_s19 = int_to_ptr.vmem [resolvable:$true] %s303_s19 }
  0x5c   : > { %v197_v5 = vld [vmem:[%s170_s29] sm:$0xff]  ;;  %v442_v6 = vpack.c.bf16 %v202_v4, %v201_v2  ;;  %v198_v7 = vld [vmem:[%s170_s29 + $0x8] sm:$0xff]  ;;  %s869_s4 = scalar_lea.hbm %s922_s2, %s420_s21  ;;  %s288_s5 = scalar_lea.sflag [#allocation4], %s849_s16 }
  0x5d   : > { %435 = vmatprep.mubr.msk.f32.mxu0 %vm203_vm0, %v197_v5  ;;  %439 = vmatprep.subr.bf16.mxu0 %v438_v3  ;;  %s581_s8 = scalar_lea.vmem %s864_s19, 256  ;;  %s673_s12 = smov [#allocation7]  }
  0x5e   : > { %441 = vmatpush3.bf16.msra.mxu0 %v438_v3  ;;  %p582_p13 = scmp.ne.s32.totalorder %s864_s19, %s581_s8  ;;  %s585_s15 = sshll.u32 %s673_s12, 4  ;;  %s586_s15 = int_to_ptr.vmem [resolvable:$false] %s585_s15 }
  0x5f   : > { %443 = vmatprep.subr.bf16.mxu0 %v442_v6  ;;  %s587_s30 = scalar_lea.vmem %s586_s15, 512  ;;  %p588_p12 = scmp.lt.s32.totalorder %s864_s19, %s586_s15 }
  0x60   : > { %p583_p6 = pnand %p582_p13, %p790_p10  ;;  %p589_p11 = scmp.lt.s32.totalorder %s587_s30, %s581_s8 }
  0x62   : > { %445 = vmatpush3.bf16.msra.mxu0 %v442_v6  ;;  %p584_p8 = pneg %p583_p6  ;;  %p590_p0 = por %p589_p11, %p588_p12 }
  0x64   : > { %p591_p5 = pnand %p590_p0, %p584_p8 }
  0x65   : > { %436 = vmatmul.mubr.msk.f32.vlgmr.msra.gmra.mrb[0].mxu0 %vm203_vm0, %v198_v7 }
 0x138   : > { %v437_v8 = vpop.f32.mrb[0].mxu0 }
 0x139   : > { %286 = vst.msk [vmem:[%s194_s17 + $0x8] sm:$0xff] %vm203_vm0, %v437_v8  ;;  %v276_v9 = vpop.f32.mrb[1].mxu0 }
 0x13a   : > { %285 = vst.msk [vmem:[%s194_s17] sm:$0xff] %vm203_vm0, %v276_v9 }
 0x13b   : > { %594 = shalt.err (!%p591_p5)
}
 0x13c   : > { %s595_s23 = scalar_lea.hbm %s869_s4, 256  ;;  %s599_s26 = scalar_lea.hbm %s922_s2, 512 }
 0x13d   : > { %p596_p9 = scmp.ne.s32.totalorder %s869_s4, %s595_s23  ;;  %p600_p3 = scmp.lt.u32.totalorder %s869_s4, %s922_s2 }
 0x13e   : > { %p601_p7 = scmp.lt.u32.totalorder %s599_s26, %s595_s23  ;;  %p603_p13 = scmp.lt.u32.totalorder %s595_s23, %s869_s4 }
 0x13f   : > { %p597_p1 = pnand %p596_p9, %p790_p10 }
 0x140   : > { %p602_p4 = por %p601_p7, %p600_p3 }
 0x141   : > { %p598_p2 = pneg %p597_p1 }
 0x142   : > { %p604_p6 = por %p603_p13, %p602_p4 }
 0x144   : > { %p605_p8 = pnand %p604_p6, %p598_p2 }
 0x146   : > { %608 = shalt.err (!%p605_p8)
}
 0x147   : > { %s674_s29 = smov 128   ;;  %s675_s17 = smov 8  }
 0x148   : > { %452 = dma.vmem_to_hbm [thread:$0]  (%p790_p10), %s864_s19, 256, %s869_s4, %s288_s5, %s674_s29, %s674_s29, %s675_s17  }
 0x149 PF: > { %s318_s21 = sand.u32 1, %s647_s9   ;;  %p940_p12 = scmp.ne.s32.totalorder %s930_s20, 0 }
 0x14a   : > { %p941_p11 = scmp.ge.s32.totalorder %s667_s14, 2  ;;  %s319_s6 = scalar_lea.sflag [#allocation4], %s318_s21 }
 0x14c   : > { %p463_p0 = pnand %p941_p11, %p940_p12 }
 0x14e   : > { %642 = dma.done.wait (!%p463_p0), %s319_s6, 256  }
 0x14f   : > { %644 = vsyncadd (!%p463_p0), %s319_s6, 4294967040  ;;  %s19_s14 = sadd.s32 1, %s667_s14   ;;  %s942_s9 = smov %s651_s10 }
 0x150   : > { %p16_p5 = scmp.ge.s32.totalorder %s19_s14, 4   ;;  %s943_s10 = smov %s655_s11 }
 0x151   : > { %s944_s11 = smov %s799_s28  ;;  %s945_s12 = smov %s663_s13 }
 0x152   : > { %s946_s13 = smov %s948_s25  ;;  %18 = sbr.rel (!%p16_p5) target bundleno = 7 (0x7), region = 77 }
 0x159   :  { %324 = vsyncpa [#allocation3], 1 }
 0x15a   :  { %326 = vsyncpa [#allocation3 + $0x1], 1 }
 0x15b   :  { %327 = vsyncpa [#allocation6], 1 }
 0x15c   :  { %328 = vsyncpa [#allocation4], 1 }
 0x15d   :  { %330 = vsyncpa [#allocation4 + $0x1], 1 }

</bundles_post_ra>
